<compile_context>
chip_gen: v7x
topology: tpu7x:2x2x1
jax: 0.10.0
libtpu: 0.0.40
codegen_flags: <defaults>
</compile_context>

<pallas_src>
import functools

import jax
import jax.numpy as jnp
from jax.experimental import pallas as pl
from jax.experimental.pallas import tpu as pltpu


_MIN_PARALLEL_STEPS = 4   # give both v7x TensorCores >= 2 grid steps each when possible


def _chip_budgets():
    """Generation-aware budgets: (x-tile target, scoped VMEM limit, resident-param cap)."""
    vmem = None
    try:
        info = pltpu.get_tpu_info()
        vmem = getattr(info, "vmem_capacity_bytes", None)
    except Exception:
        vmem = None
    if vmem is None:
        vmem = 64 * 1024 * 1024                        # assume the smallest (v7x) if unknown
    if vmem >= 100 * 1024 * 1024:                      # v5e / v6e: 128 MiB physical VMEM
        return 4 * 1024 * 1024, 64 * 1024 * 1024, 4 * 1024 * 1024
    # v7x: 64 MiB physical per TensorCore -> bigger tiles but stay well under the ceiling.
    return 6 * 1024 * 1024, 48 * 1024 * 1024, 2 * 1024 * 1024


def _largest_divisor(n, cap, multiple_of):
    """Largest d with d | n, d <= cap, d % multiple_of == 0 (None if no such d)."""
    best = None
    cap = min(n, cap)
    d = multiple_of
    while d <= cap:
        if n % d == 0:
            best = d
        d += multiple_of
    return best


def _norm_kernel_colparam(x_ref, p_ref, o_ref, *, block_rows, resident, reciprocal):
    """Params vary along rows: p is a (rows, 2) [mean | std-or-inv-std] column pair."""
    if resident:
        # Full padded param column pair is VMEM-resident for the whole grid;
        # slice this row-block's window.
        r0 = pl.multiple_of(pl.program_id(0) * block_rows, block_rows)
        p = p_ref[pl.ds(r0, block_rows), :]
    else:
        p = p_ref[...]
    m = p[:, 0:1]
    s = p[:, 1:2]
    xm = x_ref[...] - m                    # params stay f32 -> compute promotes to f32
    y = xm * s if reciprocal else xm / s
    o_ref[...] = y.astype(o_ref.dtype)


def _norm_kernel_rowparam(x_ref, p_ref, o_ref, *, reciprocal):
    """Params vary along lanes: p is a (2, cols) [mean ; std-or-inv-std] row pair."""
    m = p_ref[0:1, :]
    s = p_ref[1:2, :]
    xm = x_ref[...] - m
    y = xm * s if reciprocal else xm / s
    o_ref[...] = y.astype(o_ref.dtype)


@functools.partial(jax.jit, static_argnames=("exact_div",))
def normalization_forward(x, mean, std, *, exact_div=False):
    """Apply (x - mean) / std with per-channel mean/std, NCHW input."""
    N, C, H, W = x.shape
    dtype = x.dtype
    itemsize = dtype.itemsize
    sublane = max(8, 32 // itemsize)          # 8 for f32, 16 for bf16

    tile_target, vmem_limit, param_cap = _chip_budgets()

    # Per-channel parameter vectors kept in f32 (torch stores them as float).
    mean = jnp.asarray(mean, jnp.float32).reshape(-1)
    std = jnp.asarray(std, jnp.float32).reshape(-1)
    if mean.size == 1:
        mean = jnp.broadcast_to(mean, (C,))
    if std.size == 1:
        std = jnp.broadcast_to(std, (C,))
    # Fast path: fold the divide into one tiny per-channel reciprocal computed
    # once here, so the kernel is a pure subtract+multiply stream (DMA-bound on
    # all generations). exact_div keeps the in-kernel divide for bit parity.
    s_vec = std if exact_div else 1.0 / std

    # ---- choose a lane-dense 2D layout -------------------------------------
    HW = H * W
    CHW = C * HW
    if HW % 128 == 0:
        rows, cols = N * C, HW          # one row per (n, c); params broadcast along lanes
        param_layout = "col"
    elif CHW % 128 == 0:
        rows, cols = N, CHW             # one row per n; params expanded to a lane-dense row
        param_layout = "row"
    else:
        rows, cols = N * C, HW          # last resort: masked partial lane stores
        param_layout = "col"
    x2d = x.reshape(rows, cols)

    # ---- VMEM-budget-aware tile selection ----------------------------------
    # Lane (last) axis: keep the full row unless even a minimum-height tile
    # would blow the budget; then tile it in multiples of 128.
    if cols % 128 == 0 and cols * itemsize * sublane > tile_target:
        cap_cols = max(128, tile_target // (itemsize * sublane))
        block_cols = _largest_divisor(cols, cap_cols, 128) or cols
    else:
        block_cols = cols

    # Row (sublane) axis: prefer an exact sublane-aligned divisor of rows (no
    # tail); otherwise a sublane-aligned block with a masked partial tail.
    cap_rows = max(sublane, tile_target // (block_cols * itemsize))
    block_rows = _largest_divisor(rows, cap_rows, sublane)
    if block_rows is None:
        block_rows = rows if rows < sublane else (min(cap_rows, rows) // sublane) * sublane

    # ---- guarantee enough parallel grid steps for v7x megacore --------------
    grid_cols = cols // block_cols
    need_row_blocks = pl.cdiv(_MIN_PARALLEL_STEPS, grid_cols)
    if pl.cdiv(rows, block_rows) < need_row_blocks and rows >= need_row_blocks * sublane:
        cap2 = max(sublane, (rows // need_row_blocks) // sublane * sublane)
        smaller = _largest_divisor(rows, cap2, sublane)
        block_rows = smaller if smaller is not None else cap2
    grid_rows = pl.cdiv(rows, block_rows)
    if grid_rows * grid_cols < _MIN_PARALLEL_STEPS and cols % 128 == 0:
        need_col_blocks = min(pl.cdiv(_MIN_PARALLEL_STEPS, grid_rows), cols // 128)
        if need_col_blocks > grid_cols:
            cap_c = max(128, (cols // need_col_blocks) // 128 * 128)
            bc = _largest_divisor(cols, cap_c, 128)
            if bc is not None:
                block_cols = bc
                grid_cols = cols // block_cols
    grid = (grid_rows, grid_cols)

    # ---- parameter array (single merged ref) --------------------------------
    if param_layout == "col":
        # rows == N*C: one (mean, s) pair per (n, c) row.
        mean_rows = jnp.tile(mean, N)
        s_rows = jnp.tile(s_vec, N)
        padded_rows = grid_rows * block_rows
        if padded_rows != rows:
            pad = padded_rows - rows
            mean_rows = jnp.pad(mean_rows, (0, pad))
            s_rows = jnp.pad(s_rows, (0, pad), constant_values=1.0)  # keep tail finite
        params = jnp.stack([mean_rows, s_rows], axis=-1)             # (padded_rows, 2) f32

        # Keep the merged column pair VMEM-resident (one DMA for the whole
        # grid) when its lane-padded, DOUBLE-BUFFERED footprint is small;
        # otherwise fetch a (block_rows, 2) tile per row block.
        param_vmem_bytes = 2 * padded_rows * 128 * 4
        resident = param_vmem_bytes <= param_cap
        if resident:
            param_spec = pl.BlockSpec((padded_rows, 2), lambda i, j: (0, 0))
        else:
            param_spec = pl.BlockSpec((block_rows, 2), lambda i, j: (i, 0))
        kernel = functools.partial(_norm_kernel_colparam, block_rows=block_rows,
                                   resident=resident, reciprocal=not exact_div)
    else:
        # rows == N, cols == C*H*W: params expanded to a lane-dense row pair.
        mean_row = jnp.repeat(mean, HW)                              # (CHW,)
        s_row = jnp.repeat(s_vec, HW)
        params = jnp.stack([mean_row, s_row], axis=0)                # (2, CHW) f32
        param_spec = pl.BlockSpec((2, block_cols), lambda i, j: (0, j))
        kernel = functools.partial(_norm_kernel_rowparam, reciprocal=not exact_div)

    out2d = pl.pallas_call(
        kernel,
        out_shape=jax.ShapeDtypeStruct((rows, cols), dtype),
        grid_spec=pltpu.PrefetchScalarGridSpec(
            num_scalar_prefetch=0,
            grid=grid,
            in_specs=[
                pl.BlockSpec((block_rows, block_cols), lambda i, j: (i, j)),
                param_spec,
            ],
            out_specs=pl.BlockSpec((block_rows, block_cols), lambda i, j: (i, j)),
        ),
        compiler_params=pltpu.CompilerParams(
            dimension_semantics=("parallel", "parallel"),
            vmem_limit_bytes=vmem_limit,
        ),
        cost_estimate=pl.CostEstimate(
            flops=2 * rows * cols,
            transcendentals=0,
            bytes_accessed=2 * rows * cols * itemsize,
        ),
    )(x2d, params)

    return out2d.reshape(N, C, H, W)


if __name__ == "__main__":
    # Module __init__: in_dim = [C, H, W] (len 3/4 -> mean/std viewed as (1,C,1,1))
    N, C, H, W = 2, 4, 16, 16

    key = jax.random.PRNGKey(0)
    kx, _ = jax.random.split(key)
    x = jax.random.normal(kx, (N, C, H, W), dtype=jnp.float32)

    # Deterministic per-channel parameters (synthetic, not loaded from disk).
    mean = jnp.array([0.485, 0.456, 0.406, 0.5], dtype=jnp.float32)
    std = jnp.array([0.229, 0.224, 0.225, 0.25], dtype=jnp.float32)

    out = normalization_forward(x, mean, std)
    out = jax.block_until_ready(out)

    # Reference check (plain JAX, same broadcasting as PyTorch (1,C,1,1)).
    ref = (x - mean.reshape(1, C, 1, 1)) / std.reshape(1, C, 1, 1)
    assert out.shape == (N, C, H, W)
    assert out.dtype == x.dtype
    assert jnp.allclose(out, ref, atol=1e-5, rtol=1e-6)

    print("KERNEL_OK")
</pallas_src>

<mosaic_0001>
module attributes {stable_mosaic.version = 11 : i64} {
  func.func @_norm_kernel_colparam(%arg0: i32, %arg1: i32, %arg2: memref<8x128xf32, #tpu.memory_space<vmem>>, %arg3: memref<8x2xf32, #tpu.memory_space<vmem>>, %arg4: memref<8x128xf32, #tpu.memory_space<vmem>>) attributes {dimension_semantics = [#tpu.dimension_semantics<parallel>, #tpu.dimension_semantics<parallel>], iteration_bounds = array<i64: 1, 2>, scalar_prefetch = 0 : i64, scratch_operands = 0 : i64, tpu.core_type = #tpu.core_type<tc>, window_params = [{transform_indices = @transform_0, window_bounds = array<i64: 8, 128>}, {pipeline_mode = #tpu.pipeline_mode<synchronous>, transform_indices = @transform_1, window_bounds = array<i64: 8, 2>}, {transform_indices = @transform_2, window_bounds = array<i64: 8, 128>}]} {
    %c8_i32 = arith.constant 8 : i32
    %0 = arith.muli %arg0, %c8_i32 : i32
    %1 = tpu.assume_multiple %0, 8 : i32
    %2 = arith.index_cast %1 : i32 to index
    %c0 = arith.constant 0 : index
    %3 = vector.load %arg3[%2, %c0] : memref<8x2xf32, #tpu.memory_space<vmem>>, vector<8x2xf32>
    %4 = vector.extract_strided_slice %3 {offsets = [0, 0], sizes = [8, 1], strides = [1, 1]} : vector<8x2xf32> to vector<8x1xf32>
    %5 = vector.extract_strided_slice %3 {offsets = [0, 1], sizes = [8, 1], strides = [1, 1]} : vector<8x2xf32> to vector<8x1xf32>
    %c0_0 = arith.constant 0 : index
    %c0_1 = arith.constant 0 : index
    %6 = vector.load %arg2[%c0_0, %c0_1] : memref<8x128xf32, #tpu.memory_space<vmem>>, vector<8x128xf32>
    %7 = vector.broadcast %4 : vector<8x1xf32> to vector<8x128xf32>
    %8 = arith.subf %6, %7 : vector<8x128xf32>
    %9 = vector.broadcast %5 : vector<8x1xf32> to vector<8x128xf32>
    %10 = arith.mulf %8, %9 : vector<8x128xf32>
    %c0_2 = arith.constant 0 : index
    %c0_3 = arith.constant 0 : index
    %11 = vector.load %arg4[%c0_2, %c0_3] : memref<8x128xf32, #tpu.memory_space<vmem>>, vector<8x128xf32>
    tpu.vector_store %arg4[%c0_2, %c0_3], %10 {strides = array<i32>} : memref<8x128xf32, #tpu.memory_space<vmem>>, vector<8x128xf32>,
    return
  }
  func.func @transform_0(%arg0: i32, %arg1: i32) -> (i32, i32) {
    %c0_i32 = arith.constant 0 : i32
    return %arg0, %arg1 : i32, i32
  }
  func.func @transform_1(%arg0: i32, %arg1: i32) -> (i32, i32) {
    %c0_i32 = arith.constant 0 : i32
    %c0_i32_0 = arith.constant 0 : i32
    %c0_i32_1 = arith.constant 0 : i32
    return %c0_i32, %c0_i32_0 : i32, i32
  }
  func.func @transform_2(%arg0: i32, %arg1: i32) -> (i32, i32) {
    %c0_i32 = arith.constant 0 : i32
    return %arg0, %arg1 : i32, i32
  }
}

</mosaic_0001>

<bundles_post_ra>
// kernel: tile.17
= control target key start
LH: loop header
LB: loop body
LE: loop exit
PB: predicated region body
PF: predicated region fallthrough
CT: control target
= control target key end

     0   :  { %s22_s0 = inlined_call_operand.vmem [shape: f32[4], index: 0, kind: input, shape index: {}]   ;;  %s23_s1 = inlined_call_operand.vmem [shape: f32[2,4], index: 1, kind: output, shape index: {}]  }
   0x1   :  { %v4_v0 = vld [vmem:[%s22_s0] ss:$0 sm:$0xff] }
   0x2   :  { %5 = vst [vmem:[%s23_s1] sm:$0x3] %v4_v0 }

// kernel: tile.19
= control target key start
LH: loop header
LB: loop body
LE: loop exit
PB: predicated region body
PF: predicated region fallthrough
CT: control target
= control target key end

     0   :  { %vm7_vm0 = vcmask 31744   ;;  %vm13_vm1 = vcmask 64544   ;;  %s39_s0 = inlined_call_operand.vmem [shape: f32[2,4], index: 0, kind: input, shape index: {}]   ;;  %s40_s1 = inlined_call_operand.vmem [shape: f32[8,1], index: 1, kind: output, shape index: {}]  }
   0x1   :  { %v4_v0 = vld [vmem:[%s39_s0] sm:$0x3]  ;;  %s22_s0 = smov 4  }
   0x2   :  { %5 = vst [vmem:[#allocation1] sm:$0x3] %v4_v0 }
   0x9   :  { %v10_v1 = vld [vmem:[#allocation1 + $0x1] sm:$0x1]   ;;  %v6_v2 = vld [vmem:[#allocation1] sm:$0x1]  }
   0xa   :  { %11 = vrot.lane.b32.xlu0 %v10_v1, %s22_s0  ;;  %8 = vst.msk [vmem:[#allocation0] sm:$0x1] %vm7_vm0, %v6_v2  }
  0x7c   :  { %v12_v3 = vpop.permute.xlu0 %11  }
  0x7d   :  { %14 = vst.msk [vmem:[#allocation0] sm:$0x1] %vm13_vm1, %v12_v3  }
  0x84   :  { %v18_v4 = vld [vmem:[#allocation0] sm:$0x1] }
  0x85   :  { %20 = vst [vmem:[%s40_s1] sm:$0x1] %v18_v4 }

// kernel: normalization_forward.1
= control target key start
LH: loop header
LB: loop body
LE: loop exit
PB: predicated region body
PF: predicated region fallthrough
CT: control target
= control target key end

     0   :  { %s354_s9 = smov 0   ;;  %s356_s10 = smov 0   ;;  %s387_s0 = inlined_call_operand.vmem [shape: f32[8,256], index: 0, kind: input, shape index: {}]   ;;  %s388_s1 = inlined_call_operand.vmem [shape: f32[8,2], index: 1, kind: input, shape index: {}]   ;;  %s389_s2 = inlined_call_operand.vmem [shape: f32[8,256], index: 2, kind: output, shape index: {}]  }
   0x1   :  { %s358_s11 = smov 0  }
   0x2 LB: > { %s21_s12 = sadd.s32 1, %s331_s10  ;;  %p280_p0 = scmp.ge.s32.totalorder %s335_s11, 1  ;;  %s335_s11 = sphi %s358_s11, %s12_s11   ;;  %s331_s10 = sphi %s356_s10, %s391_s10   ;;  %s327_s9 = sphi %s354_s9, %s390_s9  }
   0x3   : > { %p22_p1 = scmp.ge.s32.totalorder %s21_s12, 2  ;;  %p131_p2 = scmp.lt.s32.totalorder %s335_s11, 3 }
   0x5   : > { %s393_s12 = smov (%p22_p1, %s21_s12), 0  ;;  %p132_p3 = pnand %p280_p0, %p131_p2 }
   0x6   : > { %v177_v0 = vld [vmem:[%s388_s1] sm:$0xff] (!%p132_p3)  ;;  %v337_v1 = vmov (!%p132_p3), 0   ;;  %v338_v2 = vmov (!%p132_p3), 1   ;;  %p161_p4 = scmp.lt.s32.totalorder (!%p132_p3), %s327_s9, 1 }
   0x7   : > { %135 = sbr.rel (%p132_p3) target bundleno = 144 (0x90), region = 28  ;;  %311 = vset.pattern.permute.xlu0 (!%p132_p3), %v337_v1 }
   0x8   : > { %181 = vperm.xlu0 (!%p132_p3), %311, %v177_v0  }
   0xc   : > { %312 = vset.pattern.permute.xlu0 (!%p132_p3), %v338_v2 }
   0xd   : > { %186 = vperm.xlu0 (!%p132_p3), %312, %v177_v0  }
   0xe   : > { %s395_s9 = smov (!%p161_p4, %s327_s9), 1 }
   0xf   : > { %s281_s15 = sshll.u32 %s395_s9, 3 }
  0x10   : > { %s166_s18 = scalar_lea.vmem %s387_s0, %s281_s15  ;;  %s174_s21 = scalar_lea.vmem %s389_s2, %s281_s15 }
  0x11   : > { %v178_v4 = vld [vmem:[%s166_s18] sm:$0xff] }
  0x87   : > { %v182_v3 = vpop.permute.xlu0 %181 }
  0x88   : > { %v184_v5 = vsub.f32 %v178_v4, %v182_v3 }
  0x8c   : > { %v187_v6 = vpop.permute.xlu0 %186 }
  0x8d   : > { %v189_v7 = vmul.f32 %v187_v6, %v184_v5 }
  0x8f   : > { %190 = vst [vmem:[%s174_s21] sm:$0xff] %v189_v7 }
  0x90 PF: > { %s12_s11 = sadd.s32 1, %s335_s11   ;;  %s390_s9 = smov %s331_s10 }
  0x91   : > { %p9_p5 = scmp.ge.s32.totalorder %s12_s11, 4   ;;  %s391_s10 = smov %s393_s12 }
  0x93   :  { %11 = sbr.rel (!%p9_p5) target bundleno = 2 (0x2), region = 59 }

</bundles_post_ra>
